<compile_context>
chip_gen: v7x
topology: tpu7x:2x2x1
jax: 0.10.0
libtpu: 0.0.40
codegen_flags: <defaults>
</compile_context>

<pallas_src>
import functools

import jax
import jax.numpy as jnp
from jax.experimental import pallas as pl
from jax.experimental.pallas import tpu as pltpu

_LANES = 128                        # TPU lane width: head output padded to this.
_VMEM_BUDGET = 48 * 1024 * 1024     # conservative: fits v7x's 64 MiB physical VMEM.


def _mlp_fused_kernel(*refs, num_hidden):
    """refs = (x, w_1, b_1, ..., w_H, b_H, w_head, b_head, out)."""
    x_ref = refs[0]
    o_ref = refs[-1]
    wb = refs[1:-1]

    compute_dtype = wb[0].dtype         # bf16 storage dtype of the weights
    # x arrives as f32 straight from HBM; cast to bf16 on the VPU here (hidden
    # in the DMA shadow) instead of paying an extra f32->bf16 HBM pass in XLA.
    h = x_ref[...].astype(compute_dtype)

    for l in range(num_hidden):
        w_ref, b_ref = wb[2 * l], wb[2 * l + 1]
        acc = jnp.dot(h, w_ref[...], preferred_element_type=jnp.float32)
        acc = acc + b_ref[...]          # f32 bias add
        acc = jnp.maximum(acc, 0.0)     # f32 ReLU (native VALU on all gens)
        h = acc.astype(compute_dtype)   # back to bf16 for the next MXU matmul

    w_ref, b_ref = wb[-2], wb[-1]       # head (out dim zero-padded to 128)
    acc = jnp.dot(h, w_ref[...], preferred_element_type=jnp.float32)
    acc = acc + b_ref[...]
    o_ref[...] = acc.astype(o_ref.dtype)   # single lane-dense (tb, 128) store


def init_mlp_params(key, input_size, hiddens=(128,), num_classes=2,
                    dtype=jnp.float32):
    """PyTorch-style nn.Linear init: U(-1/sqrt(fan_in), 1/sqrt(fan_in)).
    Weights are stored (in, out) so the kernel computes x @ W + b."""
    params = []
    last = input_size
    for out_dim in list(hiddens) + [num_classes]:
        key, kw, kb = jax.random.split(key, 3)
        bound = 1.0 / float(last) ** 0.5
        w = jax.random.uniform(kw, (last, out_dim), dtype, -bound, bound)
        b = jax.random.uniform(kb, (out_dim,), dtype, -bound, bound)
        params.append((w, b))
        last = out_dim
    return params


def prepare_params(params, storage_dtype=jnp.bfloat16):
    """Cast weights to bf16 storage, keep biases f32 as (1, F_out) blocks,
    and zero-pad the head's out dim to a 128-lane multiple (lane-dense)."""
    prepared = []
    n = len(params)
    for idx, (w, b) in enumerate(params):
        w = w.astype(storage_dtype)
        b2 = b.reshape(1, -1).astype(jnp.float32)
        if idx == n - 1:
            f_out = w.shape[1]
            pad = pl.cdiv(f_out, _LANES) * _LANES - f_out
            if pad:
                w = jnp.pad(w, ((0, 0), (0, pad)))
                b2 = jnp.pad(b2, ((0, 0), (0, pad)))
        prepared.append((w, b2))
    return prepared


def _choose_row_tile(B, row_tile):
    """Pick the batch tile. Single block for tiny B; otherwise at least two
    blocks so the 'parallel' batch axis can shard across v7x's 2 TensorCores."""
    if B <= 16:
        return B
    align = 128 if B >= 256 else 16         # sublane packing granularity
    half = pl.cdiv(pl.cdiv(B, 2), align) * align
    return max(align, min(row_tile, half))


def _vmem_bytes(tb, F_in, out_padded, prepared_params):
    """Rough VMEM estimate for one grid step (used to size tb / vmem limit)."""
    x_bytes = 2 * tb * F_in * 4             # f32 x tile, double-buffered
    o_bytes = 2 * tb * out_padded * 4       # f32 logits tile, double-buffered
    wb_bytes = 0
    for w, b2 in prepared_params:           # single-buffered (pl.Buffered(1))
        wb_bytes += w.size * w.dtype.itemsize + b2.size * b2.dtype.itemsize
    widest = max(w.shape[1] for w, _ in prepared_params)
    interm = 3 * tb * widest * 4            # live f32 intermediates (rough)
    return x_bytes + o_bytes + wb_bytes + interm


def mlp_classifier_forward(x_nchw, prepared_params, *, num_classes=2,
                           row_tile=512):
    """Fused MLPClassifier.forward. x_nchw: (B, C, H, W) -> (B, num_classes)."""
    B = x_nchw.shape[0]
    # x stays f32: the kernel casts to bf16 after the DMA, so x crosses HBM
    # exactly once (no separate XLA cast pass).
    x = x_nchw.reshape(B, -1).astype(jnp.float32)   # x.view(B, -1)
    F_in = x.shape[1]
    num_hidden = len(prepared_params) - 1
    out_padded = prepared_params[-1][0].shape[1]    # head out dim, 128-padded

    tb = _choose_row_tile(B, row_tile)
    # Shrink the tile until the estimate fits the VMEM budget (v7x: 64 MiB).
    while tb > 16 and _vmem_bytes(tb, F_in, out_padded,
                                  prepared_params) > _VMEM_BUDGET:
        tb = max(16, tb // 2)
    # TODO(synk): for image-scale F_in (W1 or the (tb, F_in) x block > ~1/4 of
    # VMEM) add a K-reduction grid axis over F_in (tiled, "arbitrary", f32
    # accumulator scratch with pl.when init/finalize) instead of whole-K loads.

    grid = (pl.cdiv(B, tb),)

    in_specs = [pl.BlockSpec((tb, F_in), lambda i: (i, 0))]
    operands = [x]
    for (w, b2) in prepared_params:
        # Grid-invariant weights/biases: constant index map + single buffer
        # -> DMA'd once, VMEM-resident, no 2x double-buffer footprint.
        in_specs.append(pl.BlockSpec(w.shape, lambda i: (0, 0),
                                     pipeline_mode=pl.Buffered(1)))
        in_specs.append(pl.BlockSpec(b2.shape, lambda i: (0, 0),
                                     pipeline_mode=pl.Buffered(1)))
        operands += [w, b2]

    # Advisory cost estimate for XLA scheduling around the custom call.
    flops = 0
    last = F_in
    for (w, _) in prepared_params:
        flops += 2 * B * last * w.shape[1]
        last = w.shape[1]
    bytes_accessed = (x.size * 4
                      + sum(w.size * w.dtype.itemsize + b2.size * 4
                            for w, b2 in prepared_params)
                      + B * out_padded * 4)
    cost = pl.CostEstimate(flops=flops, transcendentals=0,
                           bytes_accessed=bytes_accessed)

    vmem_need = _vmem_bytes(tb, F_in, out_padded, prepared_params)
    vmem_limit = int(min(_VMEM_BUDGET,
                         max(32 * 1024 * 1024,
                             int(vmem_need * 1.25) + (4 << 20))))

    kernel = functools.partial(_mlp_fused_kernel, num_hidden=num_hidden)
    out = pl.pallas_call(
        kernel,
        out_shape=jax.ShapeDtypeStruct((B, out_padded), jnp.float32),
        grid=grid,
        in_specs=in_specs,
        out_specs=pl.BlockSpec((tb, out_padded), lambda i: (i, 0)),
        compiler_params=pltpu.CompilerParams(
            dimension_semantics=("parallel",),
            vmem_limit_bytes=vmem_limit),
        cost_estimate=cost,
    )(*operands)
    return out[:, :num_classes]


def _reference_forward(x_nchw, prepared_params, num_classes=2):
    """Plain-JAX mirror of the kernel math (bf16 compute, f32 accumulate)."""
    B = x_nchw.shape[0]
    h = x_nchw.reshape(B, -1).astype(prepared_params[0][0].dtype)
    for (w, b2) in prepared_params[:-1]:
        acc = jnp.dot(h, w, preferred_element_type=jnp.float32) + b2
        h = jnp.maximum(acc, 0.0).astype(h.dtype)
    w, b2 = prepared_params[-1]
    out = jnp.dot(h, w, preferred_element_type=jnp.float32) + b2
    return out[:, :num_classes]


def _reference_forward_f32(x_nchw, params):
    """Full-f32 PyTorch-equivalent reference (sanity check on bf16 error)."""
    B = x_nchw.shape[0]
    h = x_nchw.reshape(B, -1)
    for (w, b) in params[:-1]:
        h = jnp.maximum(h @ w + b, 0.0)
    w, b = params[-1]
    return h @ w + b


if __name__ == "__main__":
    key = jax.random.PRNGKey(0)
    k_in, k_params, k_in2 = jax.random.split(key, 3)

    # small shapes: batch=2, channels=4, spatial=16 -> input_size = 4*16*16 = 1024
    B, C, H, W = 2, 4, 16, 16
    input_size = C * H * W
    hiddens = (32,)

    x = jax.random.normal(k_in, (B, C, H, W), dtype=jnp.float32)
    params = init_mlp_params(k_params, input_size, hiddens=hiddens)
    prepared = prepare_params(params)

    out = mlp_classifier_forward(x, prepared)
    out = jax.block_until_ready(out)
    assert out.shape == (B, 2), out.shape

    # Exact-math reference (same bf16 compute / f32 accumulation as the kernel).
    ref = _reference_forward(x, prepared)
    assert jnp.allclose(out, ref, atol=1e-4, rtol=1e-4), "mismatch vs bf16 reference"

    # Loose check vs the pure-f32 PyTorch-equivalent math (bf16 storage error only).
    ref32 = _reference_forward_f32(x, params)
    assert jnp.allclose(out, ref32, atol=5e-2, rtol=5e-2), "mismatch vs f32 reference"

    # Multi-tile + partial-last-tile path (exercises the parallel batch grid
    # and the masked writeback of the padded last block).
    B2 = 48
    x2 = jax.random.normal(k_in2, (B2, C, H, W), dtype=jnp.float32)
    out2 = jax.block_until_ready(mlp_classifier_forward(x2, prepared))
    assert out2.shape == (B2, 2), out2.shape
    ref2 = _reference_forward(x2, prepared)
    assert jnp.allclose(out2, ref2, atol=1e-4, rtol=1e-4), "mismatch on tiled batch"

    print("KERNEL_OK")
</pallas_src>

<mosaic_0001>
module attributes {stable_mosaic.version = 11 : i64} {
  func.func @_mlp_fused_kernel(%arg0: i32, %arg1: memref<2x1024xf32, #tpu.memory_space<vmem>>, %arg2: memref<1024x32xbf16, #tpu.memory_space<vmem>>, %arg3: memref<1x32xf32, #tpu.memory_space<vmem>>, %arg4: memref<32x128xbf16, #tpu.memory_space<vmem>>, %arg5: memref<1x128xf32, #tpu.memory_space<vmem>>, %arg6: memref<2x128xf32, #tpu.memory_space<vmem>>) attributes {dimension_semantics = [#tpu.dimension_semantics<parallel>], iteration_bounds = array<i64: 1>, scalar_prefetch = 0 : i64, scratch_operands = 0 : i64, tpu.core_type = #tpu.core_type<tc>, window_params = [{transform_indices = @transform_0, window_bounds = array<i64: 2, 1024>}, {pipeline_mode = #tpu.pipeline_mode<synchronous>, transform_indices = @transform_1, window_bounds = array<i64: 1024, 32>}, {pipeline_mode = #tpu.pipeline_mode<synchronous>, transform_indices = @transform_2, window_bounds = array<i64: 1, 32>}, {pipeline_mode = #tpu.pipeline_mode<synchronous>, transform_indices = @transform_3, window_bounds = array<i64: 32, 128>}, {pipeline_mode = #tpu.pipeline_mode<synchronous>, transform_indices = @transform_4, window_bounds = array<i64: 1, 128>}, {transform_indices = @transform_5, window_bounds = array<i64: 2, 128>}]} {
    %c0 = arith.constant 0 : index
    %c0_0 = arith.constant 0 : index
    %0 = vector.load %arg1[%c0, %c0_0] : memref<2x1024xf32, #tpu.memory_space<vmem>>, vector<2x1024xf32>
    %1 = arith.truncf %0 : vector<2x1024xf32> to vector<2x1024xbf16>
    %c0_1 = arith.constant 0 : index
    %c0_2 = arith.constant 0 : index
    %2 = vector.load %arg2[%c0_1, %c0_2] : memref<1024x32xbf16, #tpu.memory_space<vmem>>, vector<1024x32xbf16>
    %cst = arith.constant dense<0.000000e+00> : vector<2x32xf32>
    %3 = tpu.matmul %1, %2, %cst {dimension_numbers = #tpu.dot_dimension_numbers<[1], [0], [0], [1], [0, 0, 1, 1], [], []>} : vector<2x1024xbf16>, vector<1024x32xbf16>, vector<2x32xf32> -> vector<2x32xf32>
    %c0_3 = arith.constant 0 : index
    %c0_4 = arith.constant 0 : index
    %4 = vector.load %arg3[%c0_3, %c0_4] : memref<1x32xf32, #tpu.memory_space<vmem>>, vector<1x32xf32>
    %5 = vector.broadcast %4 : vector<1x32xf32> to vector<2x32xf32>
    %6 = arith.addf %3, %5 : vector<2x32xf32>
    %cst_5 = arith.constant 0.000000e+00 : f32
    %7 = vector.broadcast %cst_5 : f32 to vector<2x32xf32>
    %8 = arith.maximumf %6, %7 : vector<2x32xf32>
    %9 = arith.truncf %8 : vector<2x32xf32> to vector<2x32xbf16>
    %c0_6 = arith.constant 0 : index
    %c0_7 = arith.constant 0 : index
    %10 = vector.load %arg4[%c0_6, %c0_7] : memref<32x128xbf16, #tpu.memory_space<vmem>>, vector<32x128xbf16>
    %cst_8 = arith.constant dense<0.000000e+00> : vector<2x128xf32>
    %11 = tpu.matmul %9, %10, %cst_8 {dimension_numbers = #tpu.dot_dimension_numbers<[1], [0], [0], [1], [0, 0, 1, 1], [], []>} : vector<2x32xbf16>, vector<32x128xbf16>, vector<2x128xf32> -> vector<2x128xf32>
    %c0_9 = arith.constant 0 : index
    %c0_10 = arith.constant 0 : index
    %12 = vector.load %arg5[%c0_9, %c0_10] : memref<1x128xf32, #tpu.memory_space<vmem>>, vector<1x128xf32>
    %13 = vector.broadcast %12 : vector<1x128xf32> to vector<2x128xf32>
    %14 = arith.addf %11, %13 : vector<2x128xf32>
    %c0_11 = arith.constant 0 : index
    %c0_12 = arith.constant 0 : index
    %15 = vector.load %arg6[%c0_11, %c0_12] : memref<2x128xf32, #tpu.memory_space<vmem>>, vector<2x128xf32>
    tpu.vector_store %arg6[%c0_11, %c0_12], %14 {strides = array<i32>} : memref<2x128xf32, #tpu.memory_space<vmem>>, vector<2x128xf32>,
    return
  }
  func.func @transform_0(%arg0: i32) -> (i32, i32) {
    %c0_i32 = arith.constant 0 : i32
    %c0_i32_0 = arith.constant 0 : i32
    return %arg0, %c0_i32 : i32, i32
  }
  func.func @transform_1(%arg0: i32) -> (i32, i32) {
    %c0_i32 = arith.constant 0 : i32
    %c0_i32_0 = arith.constant 0 : i32
    %c0_i32_1 = arith.constant 0 : i32
    return %c0_i32, %c0_i32_0 : i32, i32
  }
  func.func @transform_2(%arg0: i32) -> (i32, i32) {
    %c0_i32 = arith.constant 0 : i32
    %c0_i32_0 = arith.constant 0 : i32
    %c0_i32_1 = arith.constant 0 : i32
    return %c0_i32, %c0_i32_0 : i32, i32
  }
  func.func @transform_3(%arg0: i32) -> (i32, i32) {
    %c0_i32 = arith.constant 0 : i32
    %c0_i32_0 = arith.constant 0 : i32
    %c0_i32_1 = arith.constant 0 : i32
    return %c0_i32, %c0_i32_0 : i32, i32
  }
  func.func @transform_4(%arg0: i32) -> (i32, i32) {
    %c0_i32 = arith.constant 0 : i32
    %c0_i32_0 = arith.constant 0 : i32
    %c0_i32_1 = arith.constant 0 : i32
    return %c0_i32, %c0_i32_0 : i32, i32
  }
  func.func @transform_5(%arg0: i32) -> (i32, i32) {
    %c0_i32 = arith.constant 0 : i32
    %c0_i32_0 = arith.constant 0 : i32
    return %arg0, %c0_i32 : i32, i32
  }
}

</mosaic_0001>

<bundles_post_ra>
// kernel: tpu_custom_call.1
= control target key start
LH: loop header
LB: loop body
LE: loop exit
PB: predicated region body
PF: predicated region fallthrough
CT: control target
= control target key end

     0   :  { %v30_v28 = vlaneseq  ;;  %v1103_v36 = vmov 1983009808   ;;  %s1365_s0 = inlined_call_operand.vmem [shape: f32[2,1024], index: 0, kind: input, shape index: {}]   ;;  %s1366_s1 = inlined_call_operand.vmem [shape: bf16[1024,32], index: 1, kind: input, shape index: {}]   ;;  %s1367_s2 = inlined_call_operand.vmem [shape: f32[1,32], index: 2, kind: input, shape index: {}]   ;;  %s1368_s3 = inlined_call_operand.vmem [shape: bf16[32,128], index: 3, kind: input, shape index: {}]   ;;  %s1369_s4 = inlined_call_operand.vmem [shape: f32[1,128], index: 4, kind: input, shape index: {}]   ;;  %s1370_s5 = inlined_call_operand.hbm [shape: f32[2,128], index: 5, kind: output, shape index: {}]  }
   0x1   :  { %v1011_v0 = vld [vmem:[%s1366_s1 + $0x40] sm:$0xff]   ;;  %v1015_v4 = vld [vmem:[%s1366_s1 + $0x48] sm:$0xff]   ;;  %v1019_v8 = vld [vmem:[%s1366_s1 + $0x50] sm:$0xff]   ;;  %v28_v37 = vunpack.c.l.s4 %v1103_v36 }
   0x2   :  { %v1012_v1 = vld [vmem:[%s1366_s1 + $0xc0] sm:$0xff]   ;;  %908 = vmatprep.subr.bf16.mxu0 %v1011_v0  ;;  %v1016_v5 = vld [vmem:[%s1366_s1 + $0xc8] sm:$0xff]   ;;  %v1020_v9 = vld [vmem:[%s1366_s1 + $0xd0] sm:$0xff]   ;;  %v31_v33 = vshrl.u32 %v30_v28, 7 }
   0x3   :  { %v1013_v2 = vld [vmem:[%s1366_s1] sm:$0xff]   ;;  %930 = vmatprep.subr.bf16.mxu1 %v1012_v1  ;;  %v1017_v6 = vld [vmem:[%s1366_s1 + $0x8] sm:$0xff]   ;;  %v1021_v10 = vld [vmem:[%s1366_s1 + $0x10] sm:$0xff]   ;;  %v29_v39 = vunpack.c.0.s8 %v28_v37 }
   0x4   :  { %v1014_v3 = vld [vmem:[%s1366_s1 + $0x80] sm:$0xff]   ;;  %909 = vmatpush3.bf16.msra.mxu0 %v1013_v2  ;;  %v1018_v7 = vld [vmem:[%s1366_s1 + $0x88] sm:$0xff]   ;;  %v1022_v11 = vld [vmem:[%s1366_s1 + $0x90] sm:$0xff]  }
   0x5   :  { %931 = vmatpush3.bf16.msra.mxu1 %v1014_v3  ;;  %910 = vmatprep.subr.bf16.mxu0 %v1015_v4  ;;  %v1023_v12 = vld [vmem:[%s1366_s1 + $0x58] sm:$0xff]   ;;  %v1027_v16 = vld [vmem:[%s1366_s1 + $0x60] sm:$0xff]   ;;  %v1031_v20 = vld [vmem:[%s1366_s1 + $0x68] sm:$0xff]   ;;  %v1242_v41 = vsub.s32 %v29_v39, %v31_v33 }
   0x6   :  { %932 = vmatprep.subr.bf16.mxu1 %v1016_v5  ;;  %v1024_v13 = vld [vmem:[%s1366_s1 + $0xd8] sm:$0xff]   ;;  %v1028_v17 = vld [vmem:[%s1366_s1 + $0xe0] sm:$0xff]   ;;  %v1032_v21 = vld [vmem:[%s1366_s1 + $0xe8] sm:$0xff]  }
   0x7   :  { %v1025_v14 = vld [vmem:[%s1366_s1 + $0x18] sm:$0xff]   ;;  %v1029_v18 = vld [vmem:[%s1366_s1 + $0x20] sm:$0xff]   ;;  %v1033_v22 = vld [vmem:[%s1366_s1 + $0x28] sm:$0xff]  }
   0x8   :  { %911 = vmatpush3.bf16.msra.mxu0 %v1017_v6  ;;  %v1026_v15 = vld [vmem:[%s1366_s1 + $0x98] sm:$0xff]   ;;  %v1030_v19 = vld [vmem:[%s1366_s1 + $0xa0] sm:$0xff]   ;;  %v1034_v23 = vld [vmem:[%s1366_s1 + $0xa8] sm:$0xff]  }
   0x9   :  { %933 = vmatpush3.bf16.msra.mxu1 %v1018_v7  ;;  %912 = vmatprep.subr.bf16.mxu0 %v1019_v8  ;;  %v1035_v24 = vld [vmem:[%s1366_s1 + $0x70] sm:$0xff]   ;;  %v1039_v29 = vld [vmem:[%s1366_s1 + $0x78] sm:$0xff]   ;;  %v22_v34 = vld [vmem:[%s1365_s0] sm:$0xff] }
   0xa   :  { %934 = vmatprep.subr.bf16.mxu1 %v1020_v9  ;;  %v1036_v25 = vld [vmem:[%s1366_s1 + $0xf0] sm:$0xff]   ;;  %v1040_v30 = vld [vmem:[%s1366_s1 + $0xf8] sm:$0xff]   ;;  %v1044_v35 = vld [vmem:[%s1366_s1 + $0x140] sm:$0xff]   ;;  %v26_v40 = vcombine.high %v22_v34, %v22_v34  ;;  %v33_v42 = vrot.slane %v22_v34, %v1242_v41 }
   0xb   :  { %v1037_v26 = vld [vmem:[%s1366_s1 + $0x30] sm:$0xff]   ;;  %v1041_v31 = vld [vmem:[%s1366_s1 + $0x38] sm:$0xff]   ;;  %v1045_v38 = vld [vmem:[%s1366_s1 + $0x1c0] sm:$0xff]  }
   0xc   :  { %913 = vmatpush3.bf16.msra.mxu0 %v1021_v10  ;;  %v1038_v27 = vld [vmem:[%s1366_s1 + $0xb0] sm:$0xff]   ;;  %v1042_v32 = vld [vmem:[%s1366_s1 + $0xb8] sm:$0xff]   ;;  %v40_v43 = vrot.slane %v26_v40, %v1242_v41  ;;  %v41_v44 = vcombine.high %v33_v42, %v33_v42  ;;  %v1046_v46 = vld [vmem:[%s1366_s1 + $0x100] sm:$0xff]   ;;  %v68_v47 = vpack.c.bf16 %v33_v42, %v33_v42 }
   0xd   :  { %935 = vmatpush3.bf16.msra.mxu1 %v1022_v11  ;;  %914 = vmatprep.subr.bf16.mxu0 %v1023_v12  ;;  %v1047_v49 = vld [vmem:[%s1366_s1 + $0x180] sm:$0xff]   ;;  %v1048_v52 = vld [vmem:[%s1366_s1 + $0x148] sm:$0xff]   ;;  %v1052_v56 = vld [vmem:[%s1366_s1 + $0x150] sm:$0xff]  }
   0xe   :  { %936 = vmatprep.subr.bf16.mxu1 %v1024_v13  ;;  %v42_v45 = vcombine.high %v40_v43, %v40_v43  ;;  %v70_v48 = vpack.c.bf16 %v40_v43, %v40_v43  ;;  %v69_v50 = vpack.c.bf16 %v41_v44, %v41_v44  ;;  %v1049_v53 = vld [vmem:[%s1366_s1 + $0x1c8] sm:$0xff]   ;;  %v1053_v57 = vld [vmem:[%s1366_s1 + $0x1d0] sm:$0xff]   ;;  %v1056_v60 = vld [vmem:[%s1366_s1 + $0x158] sm:$0xff]  }
   0xf   :  { %v1050_v54 = vld [vmem:[%s1366_s1 + $0x108] sm:$0xff]   ;;  %v1054_v58 = vld [vmem:[%s1366_s1 + $0x110] sm:$0xff]   ;;  %v1057_v61 = vld [vmem:[%s1366_s1 + $0x1d8] sm:$0xff]  }
  0x10   :  { %915 = vmatpush3.bf16.msra.mxu0 %v1025_v14  ;;  %v71_v51 = vpack.c.bf16 %v42_v45, %v42_v45  ;;  %627 = vmatprep.mubr.bf16.mxu0 %v69_v50  ;;  %v1051_v55 = vld [vmem:[%s1366_s1 + $0x188] sm:$0xff]   ;;  %v1055_v59 = vld [vmem:[%s1366_s1 + $0x190] sm:$0xff]   ;;  %v1058_v62 = vld [vmem:[%s1366_s1 + $0x118] sm:$0xff]  }
  0x11   :  { %937 = vmatpush3.bf16.msra.mxu1 %v1026_v15  ;;  %916 = vmatprep.subr.bf16.mxu0 %v1027_v16  ;;  %v1059_v63 = vld [vmem:[%s1366_s1 + $0x198] sm:$0xff]   ;;  %v1060_v0 = vld [vmem:[%s1366_s1 + $0x160] sm:$0xff]   ;;  %v1064_v4 = vld [vmem:[%s1366_s1 + $0x168] sm:$0xff]  }
  0x12   :  { %938 = vmatprep.subr.bf16.mxu1 %v1028_v17  ;;  %667 = vmatprep.mubr.bf16.mxu1 %v71_v51  ;;  %v1061_v1 = vld [vmem:[%s1366_s1 + $0x1e0] sm:$0xff]   ;;  %v1065_v5 = vld [vmem:[%s1366_s1 + $0x1e8] sm:$0xff]   ;;  %v1068_v8 = vld [vmem:[%s1366_s1 + $0x170] sm:$0xff]  }
  0x13   :  { %v1062_v2 = vld [vmem:[%s1366_s1 + $0x120] sm:$0xff]   ;;  %v1066_v6 = vld [vmem:[%s1366_s1 + $0x128] sm:$0xff]   ;;  %v1069_v9 = vld [vmem:[%s1366_s1 + $0x1f0] sm:$0xff]  }
  0x14   :  { %917 = vmatpush3.bf16.msra.mxu0 %v1029_v18  ;;  %v1063_v3 = vld [vmem:[%s1366_s1 + $0x1a0] sm:$0xff]   ;;  %v1067_v7 = vld [vmem:[%s1366_s1 + $0x1a8] sm:$0xff]  }
  0x15   :  { %939 = vmatpush3.bf16.msra.mxu1 %v1030_v19  ;;  %918 = vmatprep.subr.bf16.mxu0 %v1031_v20  ;;  %v23_v10 = vld [vmem:[%s1365_s0 + $0x8] sm:$0xff] }
  0x16   :  { %940 = vmatprep.subr.bf16.mxu1 %v1032_v21  ;;  %v50_v11 = vrot.slane %v23_v10, %v1242_v41  ;;  %v43_v12 = vcombine.high %v23_v10, %v23_v10 }
  0x18   :  { %919 = vmatpush3.bf16.msra.mxu0 %v1033_v22 }
  0x19   :  { %941 = vmatpush3.bf16.msra.mxu1 %v1034_v23  ;;  %920 = vmatprep.subr.bf16.mxu0 %v1035_v24 }
  0x1a   :  { %942 = vmatprep.subr.bf16.mxu1 %v1036_v25 }
  0x1c   :  { %921 = vmatpush3.bf16.msra.mxu0 %v1037_v26 }
  0x1d   :  { %943 = vmatpush3.bf16.msra.mxu1 %v1038_v27  ;;  %922 = vmatprep.subr.bf16.mxu0 %v1039_v29 }
  0x1e   :  { %944 = vmatprep.subr.bf16.mxu1 %v1040_v30 }
  0x20   :  { %923 = vmatpush3.bf16.msra.mxu0 %v1041_v31 }
  0x21   :  { %945 = vmatpush3.bf16.msra.mxu1 %v1042_v32  ;;  %952 = vmatprep.subr.bf16.mxu0 %v1044_v35 }
  0x22   :  { %974 = vmatprep.subr.bf16.mxu1 %v1045_v38 }
  0x23   :  { %628 = vmatmul.mubr.bf16.vlgmr.msra.gmra.mrb[0].mxu0 %v68_v47 }
  0x24   :  { %668 = vmatmul.mubr.bf16.vlgmr.msra.gmra.mrb[0].mxu1 %v70_v48  ;;  %953 = vmatpush3.bf16.msra.mxu0 %v1046_v46 }
  0x25   :  { %975 = vmatpush3.bf16.msra.mxu1 %v1047_v49  ;;  %954 = vmatprep.subr.bf16.mxu0 %v1048_v52 }
  0x26   :  { %976 = vmatprep.subr.bf16.mxu1 %v1049_v53 }
  0x28   :  { %955 = vmatpush3.bf16.msra.mxu0 %v1050_v54 }
  0x29   :  { %977 = vmatpush3.bf16.msra.mxu1 %v1051_v55  ;;  %956 = vmatprep.subr.bf16.mxu0 %v1052_v56 }
  0x2a   :  { %978 = vmatprep.subr.bf16.mxu1 %v1053_v57 }
  0x2c   :  { %957 = vmatpush3.bf16.msra.mxu0 %v1054_v58 }
  0x2d   :  { %979 = vmatpush3.bf16.msra.mxu1 %v1055_v59  ;;  %958 = vmatprep.subr.bf16.mxu0 %v1056_v60 }
  0x2e   :  { %980 = vmatprep.subr.bf16.mxu1 %v1057_v61 }
  0x30   :  { %959 = vmatpush3.bf16.msra.mxu0 %v1058_v62 }
  0x31   :  { %981 = vmatpush3.bf16.msra.mxu1 %v1059_v63  ;;  %960 = vmatprep.subr.bf16.mxu0 %v1060_v0 }
  0x32   :  { %982 = vmatprep.subr.bf16.mxu1 %v1061_v1 }
  0x34   :  { %961 = vmatpush3.bf16.msra.mxu0 %v1062_v2 }
  0x35   :  { %983 = vmatpush3.bf16.msra.mxu1 %v1063_v3  ;;  %962 = vmatprep.subr.bf16.mxu0 %v1064_v4 }
  0x36   :  { %984 = vmatprep.subr.bf16.mxu1 %v1065_v5 }
  0x37   :  { %10 = vsyncpa [#allocation3], 0  ;;  %v1070_v13 = vld [vmem:[%s1366_s1 + $0x130] sm:$0xff]   ;;  %v58_v15 = vcombine.high %v50_v11, %v50_v11  ;;  %v57_v16 = vrot.slane %v43_v12, %v1242_v41  ;;  %v1072_v17 = vld [vmem:[%s1366_s1 + $0x178] sm:$0xff]   ;;  %v72_v24 = vpack.c.bf16 %v50_v11, %v50_v11  ;;  %v1104_v27 = vmov 0.0   ;;  %s1106_s29 = smov [#allocation2]  }
  0x38   :  { %963 = vmatpush3.bf16.msra.mxu0 %v1066_v6  ;;  %v1071_v14 = vld [vmem:[%s1366_s1 + $0x1b0] sm:$0xff]   ;;  %v1073_v18 = vld [vmem:[%s1366_s1 + $0x1f8] sm:$0xff]   ;;  %v1077_v26 = vld [vmem:[%s1368_s3] sm:$0xff]   ;;  %vm1105_vm0 = vmmov 0   ;;  %vm780_vm1 = vcmask 261120   ;;  %s831_s30 = sshll.u32 %s1106_s29, 4  ;;  %s832_s30 = int_to_ptr.vmem [resolvable:$true] %s831_s30 }
  0x39   :  { %985 = vmatpush3.bf16.msra.mxu1 %v1067_v7  ;;  %964 = vmatprep.subr.bf16.mxu0 %v1068_v8  ;;  %v73_v19 = vpack.c.bf16 %v58_v15, %v58_v15  ;;  %v59_v20 = vcombine.high %v57_v16, %v57_v16  ;;  %v1074_v21 = vld [vmem:[%s1366_s1 + $0x138] sm:$0xff]   ;;  %v74_v25 = vpack.c.bf16 %v57_v16, %v57_v16  ;;  %v1078_v28 = vld [vmem:[%s1368_s3 + $0x8] sm:$0xff]   ;;  %v839_v31 = vld [vmem:[%s1367_s2] ss:$0 sm:$0xff]  ;;  %s1079_s6 = scalar_lea.vmem %s832_s30, 32  ;;  %p1084_p1 = scmp.lt.s32.totalorder %s832_s30, %s832_s30 }
  0x3a   :  { %986 = vmatprep.subr.bf16.mxu1 %v1069_v9  ;;  %v1075_v22 = vld [vmem:[%s1366_s1 + $0x1b8] sm:$0xff]   ;;  %v904_v56 = vld [vmem:[%s1369_s4] ss:$0 sm:$0xff]  ;;  %p1080_p0 = scmp.ne.s32.totalorder %s832_s30, %s1079_s6  ;;  %p1085_p2 = scmp.lt.s32.totalorder %s1079_s6, %s1079_s6 }
  0x3b   :  { %v75_v23 = vpack.c.bf16 %v59_v20, %v59_v20  ;;  %707 = vmatprep.mubr.bf16.mxu0 %v73_v19 }
  0x3c   :  { %965 = vmatpush3.bf16.msra.mxu0 %v1070_v13  ;;  %p1086_p3 = por %p1085_p2, %p1084_p1 }
  0x3d   :  { %987 = vmatpush3.bf16.msra.mxu1 %v1071_v14  ;;  %966 = vmatprep.subr.bf16.mxu0 %v1072_v17 }
  0x3e   :  { %988 = vmatprep.subr.bf16.mxu1 %v1073_v18  ;;  %747 = vmatprep.mubr.bf16.mxu1 %v75_v23  ;;  %p1087_p4 = pnand %p1086_p3, %p1080_p0 }
  0x40   :  { %967 = vmatpush3.bf16.msra.mxu0 %v1074_v21 }
  0x41   :  { %989 = vmatpush3.bf16.msra.mxu1 %v1075_v22  ;;  %999 = vmatprep.subr.bf16.mxu0 %v1104_v27 }
  0x43   :  { %708 = vmatmul.mubr.bf16.vlgmr.msra.gmra.mrb[4].mxu0 %v72_v24 }
  0x44   :  { %748 = vmatmul.mubr.bf16.vlgmr.msra.gmra.mrb[4].mxu1 %v74_v25  ;;  %1000 = vmatpush3.bf16.msra.mxu0 %v1077_v26 }
  0x45   :  { %1001 = vmatprep.subr.bf16.mxu0 %v1104_v27  ;;  %1003 = vmatprep.mubr.msk.bf16.mxu0 %vm1105_vm0, %v1104_v27 }
  0x48   :  { %1002 = vmatpush3.bf16.msra.mxu0 %v1078_v28 }
  0xf6   :  { %v924_v29 = vpop.f32.mrb[0].mxu0 }
  0xf7   :  { %v946_v30 = vpop.f32.mrb[0].mxu1  ;;  %v925_v32 = vpop.f32.mrb[1].mxu0 }
  0xf8   :  { %v947_v33 = vpop.f32.mrb[1].mxu1  ;;  %v926_v34 = vadd.f32 %v925_v32, %v924_v29  ;;  %v927_v36 = vpop.f32.mrb[2].mxu0 }
  0xf9   :  { %v948_v35 = vadd.f32 %v947_v33, %v946_v30  ;;  %v949_v37 = vpop.f32.mrb[2].mxu1  ;;  %v928_v38 = vpop.f32.mrb[3].mxu0 }
  0xfa   :  { %v950_v39 = vpop.f32.mrb[3].mxu1  ;;  %v630_v40 = vadd.f32 %v926_v34, %v839_v31 }
  0xfc   :  { %v670_v41 = vadd.f32 %v948_v35, %v630_v40 }
 0x116   :  { %v968_v42 = vpop.f32.mrb[4].mxu0 }
 0x117   :  { %v990_v43 = vpop.f32.mrb[4].mxu1  ;;  %v969_v44 = vpop.f32.mrb[5].mxu0 }
 0x118   :  { %v991_v45 = vpop.f32.mrb[5].mxu1  ;;  %v970_v46 = vadd.f32 %v969_v44, %v968_v42  ;;  %v971_v48 = vpop.f32.mrb[6].mxu0 }
 0x119   :  { %v992_v47 = vadd.f32 %v991_v45, %v990_v43  ;;  %v993_v49 = vpop.f32.mrb[6].mxu1  ;;  %v972_v50 = vpop.f32.mrb[7].mxu0 }
 0x11a   :  { %v994_v51 = vpop.f32.mrb[7].mxu1  ;;  %v710_v52 = vadd.f32 %v970_v46, %v670_v41 }
 0x11c   :  { %v750_v53 = vadd.f32 %v992_v47, %v710_v52 }
 0x11e   :  { %v755_v54 = vmax.f32 %v750_v53, 0.0 }
 0x120   :  { %v756_v55 = vpack.c.bf16 %v755_v54, %v755_v54 }
 0x122   :  { %1004 = vmatmul.mubr.msk.bf16.vlgmr.msra.gmra.mrb[8].mxu0 %vm780_vm1, %v756_v55 }
 0x1f5   :  { %v818_v57 = vpop.f32.mrb[8].mxu0 }
 0x1f6   :  { %v819_v58 = vadd.f32 %v904_v56, %v818_v57  ;;  %v1005_v59 = vpop.f32.mrb[9].mxu0 }
 0x1f7   :  { %v821_v60 = vpop.f32.mrb[10].mxu0 }
 0x1f8   :  { %824 = vst [vmem:[#allocation2] sm:$0x3] %v819_v58  ;;  %v1006_v61 = vpop.f32.mrb[11].mxu0 }
 0x1f9   :  { %1090 = shalt.err (!%p1087_p4)
}
 0x1fa   :  { %s1091_s4 = scalar_lea.hbm %s1370_s5, 32 }
 0x1fb   :  { %p1092_p5 = scmp.ne.s32.totalorder %s1370_s5, %s1091_s4  ;;  %p1095_p6 = scmp.lt.u32.totalorder %s1091_s4, %s1370_s5 }
 0x1fd   :  { %p1097_p7 = pnand %p1095_p6, %p1092_p5 }
 0x1ff   :  { %1100 = shalt.err (!%p1097_p7)
}
 0x200   :  { %834 = dma.vmem_to_hbm [thread:$0]  %s832_s30, 32, %s1370_s5, [#allocation3]  }
 0x201   :  { %1101 = dma.done.wait [#allocation3], 32  }
 0x202   :  { %1102 = vsyncadd [#allocation3], 4294967264 }
 0x203   :  { %838 = vsyncpa [#allocation3], 1 }

</bundles_post_ra>
